<compile_context>
chip_gen: v5e
topology: v5e:2x2
jax: 0.10.0
libtpu: 0.0.40
codegen_flags: <defaults>
</compile_context>

<pallas_src>
import functools

import jax
import jax.numpy as jnp
from jax.experimental import pallas as pl
from jax.experimental.pallas import tpu as pltpu

BN_EPS = 1e-5
MAX_SINGLE_K = 2048               # largest contraction handled without a k grid axis
TK_MULTI = 512                    # k tile when a reduction grid axis is needed
MIN_PALLAS_M = 256                # below this many output positions, let XLA do it
MAX_TN = 8192                     # largest lane tile
MAX_X_BLOCK_BYTES = 4 * 1024 * 1024   # double-buffered X stays under ~8 MiB (v5e scoped VMEM)


def _round_up(x, m):
    return (x + m - 1) // m * m


def _apply_act(y, act):
    if act == "leaky":
        return jnp.where(y >= 0, y, 0.2 * y)
    if act == "relu":
        return jnp.maximum(y, 0.0)
    if act == "tanh":
        return jnp.tanh(y)
    return y                                      # "linear"


# ----------------------------------------------------------------------------
# Pallas kernels: out = act((W @ P) * scale + bias), channels on sublanes
# ----------------------------------------------------------------------------
def _fused_kernel_1k(w_ref, x_ref, s_ref, b_ref, o_ref, *, act):
    # Whole contraction fits one (full-extent, unpadded) block: no scratch,
    # no init/finalize.
    y = jnp.dot(w_ref[...], x_ref[...], preferred_element_type=jnp.float32)
    y = y * s_ref[...] + b_ref[...]
    o_ref[...] = _apply_act(y, act).astype(o_ref.dtype)


def _fused_kernel_acc(w_ref, x_ref, s_ref, b_ref, o_ref, acc_ref, *, act):
    @pl.when(pl.program_id(2) == 0)
    def _():
        acc_ref[...] = jnp.zeros_like(acc_ref)

    acc_ref[...] += jnp.dot(w_ref[...], x_ref[...],
                            preferred_element_type=jnp.float32)

    @pl.when(pl.program_id(2) == pl.num_programs(2) - 1)
    def _():
        y = acc_ref[...] * s_ref[...] + b_ref[...]
        o_ref[...] = _apply_act(y, act).astype(o_ref.dtype)


def _pick_tn(M, k_block, G):
    """Lane tile: as big as possible (per-step overhead dominates at small
    tiles), capped by VMEM, and keeping >=2 total grid units for v7x megacore."""
    tn = 256
    for cand in (MAX_TN, 4096, 2048, 1024, 512):
        if M >= cand:
            tn = cand
            break
    while tn > 256 and k_block * tn * 2 > MAX_X_BLOCK_BYTES:
        tn //= 2
    if G * ((M + tn - 1) // tn) < 2 and tn > 256:
        tn //= 2
    return tn


def _matmul_pallas(w, pt, scale, bias, act, out_dtype):
    """w: (G, O, K), pt: (G, K, M) -> (G, O, M). bf16 MXU, f32 accumulation."""
    G, O, K = w.shape
    M = pt.shape[2]
    O_pad = _round_up(O, 8)

    single_k = K <= MAX_SINGLE_K
    if single_k:
        TK = K_pad = K            # full-extent contraction block: no K padding
    else:
        TK = TK_MULTI
        K_pad = _round_up(K, TK)

    TN = _pick_tn(M, TK, G)
    M_pad = _round_up(M, TN)

    wb = w.astype(jnp.bfloat16)
    if O_pad != O or K_pad != K:
        wb = jnp.pad(wb, ((0, 0), (0, O_pad - O), (0, K_pad - K)))
    xb = pt if pt.dtype == jnp.bfloat16 else pt.astype(jnp.bfloat16)
    if K_pad != K or M_pad != M:
        xb = jnp.pad(xb, ((0, 0), (0, K_pad - K), (0, M_pad - M)))
    s = scale.astype(jnp.float32).reshape(O, 1)
    b = bias.astype(jnp.float32).reshape(O, 1)
    if O_pad != O:
        s = jnp.pad(s, ((0, O_pad - O), (0, 0)))
        b = jnp.pad(b, ((0, O_pad - O), (0, 0)))

    if single_k:
        grid = (G, M_pad // TN)
        kernel = functools.partial(_fused_kernel_1k, act=act)
        in_specs = [
            pl.BlockSpec((None, O_pad, K_pad), lambda g, j: (g, 0, 0)),
            pl.BlockSpec((None, K_pad, TN), lambda g, j: (g, 0, j)),
            pl.BlockSpec((O_pad, 1), lambda g, j: (0, 0)),
            pl.BlockSpec((O_pad, 1), lambda g, j: (0, 0)),
        ]
        out_spec = pl.BlockSpec((None, O_pad, TN), lambda g, j: (g, 0, j))
        scratch = []
        sems = ("parallel", "parallel")
    else:
        grid = (G, M_pad // TN, K_pad // TK)
        kernel = functools.partial(_fused_kernel_acc, act=act)
        in_specs = [
            pl.BlockSpec((None, O_pad, TK), lambda g, j, k: (g, 0, k)),
            pl.BlockSpec((None, TK, TN), lambda g, j, k: (g, k, j)),
            pl.BlockSpec((O_pad, 1), lambda g, j, k: (0, 0)),
            pl.BlockSpec((O_pad, 1), lambda g, j, k: (0, 0)),
        ]
        out_spec = pl.BlockSpec((None, O_pad, TN), lambda g, j, k: (g, 0, j))
        scratch = [pltpu.VMEM((O_pad, TN), jnp.float32)]
        sems = ("parallel", "parallel", "arbitrary")

    out = pl.pallas_call(
        kernel,
        out_shape=jax.ShapeDtypeStruct((G, O_pad, M_pad), out_dtype),
        grid_spec=pltpu.PrefetchScalarGridSpec(
            num_scalar_prefetch=0,
            grid=grid,
            in_specs=in_specs,
            out_specs=out_spec,
            scratch_shapes=scratch,
        ),
        compiler_params=pltpu.CompilerParams(dimension_semantics=sems),
    )(wb, xb, s, b)

    if O_pad != O or M_pad != M:
        out = out[:, :O, :M]
    return out


def _matmul_xla(w, pt, scale, bias, act, out_dtype):
    # Tiny deep layers (M < 256): less than one MXU tile of work — launch/glue
    # overhead dominates, so let XLA handle them directly (f32 compute).
    y = jnp.einsum("gok,gkm->gom", w.astype(jnp.float32), pt.astype(jnp.float32))
    y = (y * scale.astype(jnp.float32)[None, :, None]
         + bias.astype(jnp.float32)[None, :, None])
    return _apply_act(y, act).astype(out_dtype)


def fused_matmul(w, pt, scale, bias, act, out_dtype, force_xla=False):
    if (not force_xla) and pt.shape[2] >= MIN_PALLAS_M:
        return _matmul_pallas(w, pt, scale, bias, act, out_dtype)
    return _matmul_xla(w, pt, scale, bias, act, out_dtype)


# ----------------------------------------------------------------------------
# Conv2d(4, s=2, p=1) and ConvTranspose2d(4, s=2, p=1), NCHW
# ----------------------------------------------------------------------------
def conv_down(x, p, act, reflect, out_dtype, force_xla=False):
    """Conv2d(Cin->Cout, 4, stride=2, padding=1). x: (N, C, H, W)."""
    w = p["w"]                                   # (O, C, 4, 4)
    N, C, H, W = x.shape
    O = w.shape[0]
    Ho, Wo = H // 2, W // 2
    mode = "reflect" if reflect else "constant"
    xp = jnp.pad(x, ((0, 0), (0, 0), (1, 1), (1, 1)), mode=mode)
    # channel-major im2col, K order (c, kh, kw), M order (n, ho, wo)
    slices = [xp[:, :, kh:kh + 2 * Ho:2, kw:kw + 2 * Wo:2]
              for kh in range(4) for kw in range(4)]          # each (N,C,Ho,Wo)
    patches = jnp.stack(slices, axis=2)                        # (N,C,16,Ho,Wo)
    patches = patches.transpose(1, 2, 0, 3, 4).reshape(C * 16, N * Ho * Wo)
    w2 = w.reshape(O, C * 16)
    y = fused_matmul(w2[None], patches[None], p["scale"], p["bias"], act,
                     out_dtype, force_xla)
    return y[0].reshape(O, N, Ho, Wo).transpose(1, 0, 2, 3)    # (N,O,Ho,Wo)


def conv_up(x, p, act, out_dtype, force_xla=False):
    """ConvTranspose2d(Cin->Cout, 4, stride=2, padding=1) via 4-phase sub-pixel
    decomposition: each output-parity phase is a stride-1 2x2 conv (K = C*4)."""
    w = p["w"]                                   # (C, O, 4, 4)  PyTorch layout
    N, C, H, W = x.shape
    O = w.shape[1]
    xp = jnp.pad(x, ((0, 0), (0, 0), (1, 1), (1, 1)))
    # per-phase patches: P[eh*2+ew, c*4+dh*2+dw, m] = xp[n, c, h+eh+dh, w+ew+dw]
    phase_patches = []
    for eh in range(2):
        for ew in range(2):
            sl = [xp[:, :, eh + dh:eh + dh + H, ew + dw:ew + dw + W]
                  for dh in range(2) for dw in range(2)]       # each (N,C,H,W)
            pp = jnp.stack(sl, axis=2)                          # (N,C,4,H,W)
            pp = pp.transpose(1, 2, 0, 3, 4).reshape(C * 4, N * H * W)
            phase_patches.append(pp)
    patches = jnp.stack(phase_patches, axis=0)                  # (4, C*4, M)

    # phase weights: Wp[eh*2+ew, o, c*4+dh*2+dw] = w[c, o, 3-eh-2dh, 3-ew-2dw]
    wf = w[:, :, ::-1, ::-1]                                    # flipped kernel
    wr = wf.reshape(C, O, 2, 2, 2, 2)                           # (c,o,dh,eh,dw,ew)
    wp = wr.transpose(3, 5, 1, 0, 2, 4).reshape(4, O, C * 4)    # (phase,o,c*4)

    y = fused_matmul(wp, patches, p["scale"], p["bias"], act,
                     out_dtype, force_xla)                      # (4,O,M)
    y = y.reshape(2, 2, O, N, H, W).transpose(3, 2, 4, 0, 5, 1)
    return y.reshape(N, O, 2 * H, 2 * W)


# ----------------------------------------------------------------------------
# Deterministic parameter initialization (synthetic; shapes follow __init__)
# ----------------------------------------------------------------------------
def _conv_layer(key, cin, cout, transpose, has_bias, has_bn):
    kw_, kb_ = jax.random.split(key)
    wshape = (cin, cout, 4, 4) if transpose else (cout, cin, 4, 4)
    w = 0.02 * jax.random.normal(kw_, wshape, jnp.float32)
    if has_bn:
        kg, kb = jax.random.split(kb_)
        gamma = 1.0 + 0.02 * jax.random.normal(kg, (cout,), jnp.float32)
        beta = 0.02 * jax.random.normal(kb, (cout,), jnp.float32)
        scale = gamma / jnp.sqrt(1.0 + BN_EPS)     # eval-mode BN (mean=0, var=1)
        bias = beta
    elif has_bias:
        scale = jnp.ones((cout,), jnp.float32)
        bias = 0.02 * jax.random.normal(kb_, (cout,), jnp.float32)
    else:
        scale = jnp.ones((cout,), jnp.float32)
        bias = jnp.zeros((cout,), jnp.float32)
    return {"w": w, "scale": scale, "bias": bias}


def init_params(key, in_channels=3, feature=8):
    f = feature
    specs = {
        "initial":    (in_channels, f,      False, True,  False),
        "down1":      (f,       f * 2,      False, False, True),
        "down2":      (f * 2,   f * 4,      False, False, True),
        "down3":      (f * 4,   f * 8,      False, False, True),
        "down4":      (f * 8,   f * 8,      False, False, True),
        "down5":      (f * 8,   f * 8,      False, False, True),
        "down6":      (f * 8,   f * 8,      False, False, True),
        "bottleneck": (f * 8,   f * 8,      False, True,  False),
        "up1":        (f * 8,   f * 8,      True,  False, True),
        "up2":        (f * 16,  f * 8,      True,  False, True),
        "up3":        (f * 16,  f * 8,      True,  False, True),
        "up4":        (f * 16,  f * 8,      True,  False, True),
        "up5":        (f * 16,  f * 4,      True,  False, True),
        "up6":        (f * 8,   f * 2,      True,  False, True),
        "up7":        (f * 4,   f,          True,  False, True),
        "final":      (f * 2,   in_channels, True, True,  False),
    }
    keys = jax.random.split(key, len(specs))
    return {name: _conv_layer(k, *spec)
            for k, (name, spec) in zip(keys, specs.items())}


# ----------------------------------------------------------------------------
# Full forward pass (matches Pix2pix_Generator.forward)
# ----------------------------------------------------------------------------
def pix2pix_forward(params, x):
    dt = jnp.bfloat16                               # intermediate activations
    x = x.astype(dt)                                # bf16 glue from the first im2col on

    d1 = conv_down(x,  params["initial"], "leaky", True,  dt)
    d2 = conv_down(d1, params["down1"],   "leaky", True,  dt)
    d3 = conv_down(d2, params["down2"],   "leaky", True,  dt)
    d4 = conv_down(d3, params["down3"],   "leaky", True,  dt)
    d5 = conv_down(d4, params["down4"],   "leaky", True,  dt)
    d6 = conv_down(d5, params["down5"],   "leaky", True,  dt)
    d7 = conv_down(d6, params["down6"],   "leaky", True,  dt)
    bott = conv_down(d7, params["bottleneck"], "relu", False, dt)

    cat = lambda a, b: jnp.concatenate([a, b], axis=1)          # torch.cat dim=1
    up1 = conv_up(bott,         params["up1"], "relu", dt)      # dropout: identity (eval)
    up2 = conv_up(cat(up1, d7), params["up2"], "relu", dt)
    up3 = conv_up(cat(up2, d6), params["up3"], "relu", dt)
    up4 = conv_up(cat(up3, d5), params["up4"], "relu", dt)
    up5 = conv_up(cat(up4, d4), params["up5"], "relu", dt)
    up6 = conv_up(cat(up5, d3), params["up6"], "relu", dt)
    up7 = conv_up(cat(up6, d2), params["up7"], "relu", dt)
    out = conv_up(cat(up7, d1), params["final"], "tanh", jnp.float32)
    return out                                                   # NCHW


if __name__ == "__main__":
    # 8 stride-2 downsamples -> spatial must be 256 (bottleneck 1x1).
    # Keep it small via batch=1 and feature=8 (instead of 64).
    B, C_IN, HW, FEAT = 1, 3, 256, 8

    key = jax.random.PRNGKey(0)
    k_param, k_data, k_chk = jax.random.split(key, 3)
    params = init_params(k_param, in_channels=C_IN, feature=FEAT)
    x = jax.random.normal(k_data, (B, C_IN, HW, HW), jnp.float32)

    # ---- check 1: Pallas fused GEMM vs XLA reference on identical bf16 operands
    kc = jax.random.split(k_chk, 8)
    Gc, Oc, Kc, Mc = 2, 6, 48, 384          # exercises O- and M-padding paths
    wt = jax.random.normal(kc[0], (Gc, Oc, Kc), jnp.float32)
    px = jax.random.normal(kc[1], (Gc, Kc, Mc), jnp.float32).astype(jnp.bfloat16)
    sc = 1.0 + 0.1 * jax.random.normal(kc[2], (Oc,), jnp.float32)
    bi = 0.1 * jax.random.normal(kc[3], (Oc,), jnp.float32)
    got = _matmul_pallas(wt, px, sc, bi, "leaky", jnp.float32)
    ref = _matmul_xla(wt.astype(jnp.bfloat16), px, sc, bi, "leaky", jnp.float32)
    assert got.shape == ref.shape, (got.shape, ref.shape)
    assert bool(jnp.allclose(got, ref, rtol=2e-2, atol=2e-2)), "Pallas GEMM mismatch"

    # ---- check 2: conv decompositions vs lax convolutions (exact f32 path)
    xs = jax.random.normal(kc[4], (2, 3, 16, 16), jnp.float32)
    wd = 0.1 * jax.random.normal(kc[5], (8, 3, 4, 4), jnp.float32)
    pd = {"w": wd, "scale": jnp.full((8,), 1.3, jnp.float32),
          "bias": jnp.full((8,), 0.1, jnp.float32)}
    got_d = conv_down(xs, pd, "linear", True, jnp.float32, force_xla=True)
    ref_d = jax.lax.conv_general_dilated(
        jnp.pad(xs, ((0, 0), (0, 0), (1, 1), (1, 1)), mode="reflect"),
        wd, (2, 2), "VALID", dimension_numbers=("NCHW", "OIHW", "NCHW"))
    ref_d = ref_d * 1.3 + 0.1
    assert bool(jnp.allclose(got_d, ref_d, rtol=1e-4, atol=1e-4)), "conv_down mismatch"

    xu = jax.random.normal(kc[6], (2, 4, 8, 8), jnp.float32)
    wu = 0.1 * jax.random.normal(kc[7], (4, 6, 4, 4), jnp.float32)  # torch (Cin,Cout,4,4)
    pu = {"w": wu, "scale": jnp.ones((6,), jnp.float32),
          "bias": jnp.zeros((6,), jnp.float32)}
    got_u = conv_up(xu, pu, "linear", jnp.float32, force_xla=True)
    w_conv = jnp.transpose(wu, (1, 0, 2, 3))[:, :, ::-1, ::-1]      # flip + in/out swap
    ref_u = jax.lax.conv_general_dilated(
        xu, w_conv, window_strides=(1, 1), padding=((2, 2), (2, 2)),
        lhs_dilation=(2, 2), dimension_numbers=("NCHW", "OIHW", "NCHW"))
    assert bool(jnp.allclose(got_u, ref_u, rtol=1e-4, atol=1e-4)), "conv_up mismatch"

    # ---- full forward pass ----
    fwd = jax.jit(pix2pix_forward)
    y = fwd(params, x)
    jax.block_until_ready(y)

    assert y.shape == (B, C_IN, HW, HW), y.shape
    assert bool(jnp.all(jnp.isfinite(y)))
    print("KERNEL_OK")
</pallas_src>

<mosaic_0001>
module attributes {stable_mosaic.version = 11 : i64} {
  func.func @_fused_kernel_1k(%arg0: i32, %arg1: i32, %arg2: memref<1x8x48xbf16, #tpu.memory_space<vmem>>, %arg3: memref<1x48x256xbf16, #tpu.memory_space<vmem>>, %arg4: memref<8x1xf32, #tpu.memory_space<vmem>>, %arg5: memref<8x1xf32, #tpu.memory_space<vmem>>, %arg6: memref<1x8x256xf32, #tpu.memory_space<vmem>>) attributes {dimension_semantics = [#tpu.dimension_semantics<parallel>, #tpu.dimension_semantics<parallel>], iteration_bounds = array<i64: 2, 2>, scalar_prefetch = 0 : i64, scratch_operands = 0 : i64, tpu.core_type = #tpu.core_type<tc>, window_params = [{transform_indices = @transform_0, window_bounds = array<i64: 1, 8, 48>}, {transform_indices = @transform_1, window_bounds = array<i64: 1, 48, 256>}, {pipeline_mode = #tpu.pipeline_mode<synchronous>, transform_indices = @transform_2, window_bounds = array<i64: 8, 1>}, {pipeline_mode = #tpu.pipeline_mode<synchronous>, transform_indices = @transform_3, window_bounds = array<i64: 8, 1>}, {transform_indices = @transform_4, window_bounds = array<i64: 1, 8, 256>}]} {
    %c0 = arith.constant 0 : index
    %c0_0 = arith.constant 0 : index
    %c0_1 = arith.constant 0 : index
    %0 = vector.load %arg2[%c0, %c0_0, %c0_1] : memref<1x8x48xbf16, #tpu.memory_space<vmem>>, vector<1x8x48xbf16>
    %1 = vector.shape_cast %0 : vector<1x8x48xbf16> to vector<8x48xbf16>
    %c0_2 = arith.constant 0 : index
    %c0_3 = arith.constant 0 : index
    %c0_4 = arith.constant 0 : index
    %2 = vector.load %arg3[%c0_2, %c0_3, %c0_4] : memref<1x48x256xbf16, #tpu.memory_space<vmem>>, vector<1x48x256xbf16>
    %3 = vector.shape_cast %2 : vector<1x48x256xbf16> to vector<48x256xbf16>
    %cst = arith.constant dense<0.000000e+00> : vector<8x256xf32>
    %4 = tpu.matmul %1, %3, %cst {dimension_numbers = #tpu.dot_dimension_numbers<[1], [0], [0], [1], [0, 0, 1, 1], [], []>} : vector<8x48xbf16>, vector<48x256xbf16>, vector<8x256xf32> -> vector<8x256xf32>
    %c0_5 = arith.constant 0 : index
    %c0_6 = arith.constant 0 : index
    %5 = vector.load %arg4[%c0_5, %c0_6] : memref<8x1xf32, #tpu.memory_space<vmem>>, vector<8x1xf32>
    %6 = vector.broadcast %5 : vector<8x1xf32> to vector<8x256xf32>
    %7 = arith.mulf %4, %6 : vector<8x256xf32>
    %c0_7 = arith.constant 0 : index
    %c0_8 = arith.constant 0 : index
    %8 = vector.load %arg5[%c0_7, %c0_8] : memref<8x1xf32, #tpu.memory_space<vmem>>, vector<8x1xf32>
    %9 = vector.broadcast %8 : vector<8x1xf32> to vector<8x256xf32>
    %10 = arith.addf %7, %9 : vector<8x256xf32>
    %cst_9 = arith.constant 0.000000e+00 : f32
    %11 = vector.broadcast %cst_9 : f32 to vector<8x256xf32>
    %12 = arith.cmpf oge, %10, %11 : vector<8x256xf32>
    %cst_10 = arith.constant 2.000000e-01 : f32
    %13 = vector.broadcast %cst_10 : f32 to vector<8x256xf32>
    %14 = arith.mulf %13, %10 : vector<8x256xf32>
    %15 = arith.select %12, %10, %14 : vector<8x256xi1>, vector<8x256xf32>
    %c0_11 = arith.constant 0 : index
    %c0_12 = arith.constant 0 : index
    %c0_13 = arith.constant 0 : index
    %16 = vector.load %arg6[%c0_11, %c0_12, %c0_13] : memref<1x8x256xf32, #tpu.memory_space<vmem>>, vector<1x8x256xf32>
    %17 = vector.shape_cast %16 : vector<1x8x256xf32> to vector<8x256xf32>
    %18 = vector.shape_cast %15 : vector<8x256xf32> to vector<1x8x256xf32>
    tpu.vector_store %arg6[%c0_11, %c0_12, %c0_13], %18 {strides = array<i32>} : memref<1x8x256xf32, #tpu.memory_space<vmem>>, vector<1x8x256xf32>,
    return
  }
  func.func @transform_0(%arg0: i32, %arg1: i32) -> (i32, i32, i32) {
    %c0_i32 = arith.constant 0 : i32
    %c0_i32_0 = arith.constant 0 : i32
    %c0_i32_1 = arith.constant 0 : i32
    return %arg0, %c0_i32, %c0_i32_0 : i32, i32, i32
  }
  func.func @transform_1(%arg0: i32, %arg1: i32) -> (i32, i32, i32) {
    %c0_i32 = arith.constant 0 : i32
    %c0_i32_0 = arith.constant 0 : i32
    return %arg0, %c0_i32, %arg1 : i32, i32, i32
  }
  func.func @transform_2(%arg0: i32, %arg1: i32) -> (i32, i32) {
    %c0_i32 = arith.constant 0 : i32
    %c0_i32_0 = arith.constant 0 : i32
    %c0_i32_1 = arith.constant 0 : i32
    return %c0_i32, %c0_i32_0 : i32, i32
  }
  func.func @transform_3(%arg0: i32, %arg1: i32) -> (i32, i32) {
    %c0_i32 = arith.constant 0 : i32
    %c0_i32_0 = arith.constant 0 : i32
    %c0_i32_1 = arith.constant 0 : i32
    return %c0_i32, %c0_i32_0 : i32, i32
  }
  func.func @transform_4(%arg0: i32, %arg1: i32) -> (i32, i32, i32) {
    %c0_i32 = arith.constant 0 : i32
    %c0_i32_0 = arith.constant 0 : i32
    return %arg0, %c0_i32, %arg1 : i32, i32, i32
  }
}

</mosaic_0001>

<bundles_post_ra>
// kernel: tpu_custom_call.1
= control target key start
LH: loop header
LB: loop body
LE: loop exit
PB: predicated region body
PF: predicated region fallthrough
CT: control target
= control target key end

     0   :  { %9 = vsyncpa [#allocation3], 0  ;;  %s917_s0 = inlined_call_operand.vmem [shape: bf16[2,8,48], index: 0, kind: input, shape index: {}]   ;;  %s918_s1 = inlined_call_operand.hbm [shape: bf16[2,48,512], index: 1, kind: input, shape index: {}]   ;;  %s919_s2 = inlined_call_operand.vmem [shape: f32[8,1], index: 2, kind: input, shape index: {}]   ;;  %s920_s3 = inlined_call_operand.vmem [shape: f32[8,1], index: 3, kind: input, shape index: {}]   ;;  %s921_s4 = inlined_call_operand.hbm [shape: f32[2,8,512], index: 4, kind: output, shape index: {}]  }
   0x1   :  { %11 = vsyncpa [#allocation3 + $0x1], 0 }
   0x2   :  { %12 = vsyncpa [#allocation4], 0 }
   0x3   :  { %14 = vsyncpa [#allocation4 + $0x1], 0  ;;  %s757_s15 = smov 0   ;;  %s759_s16 = smov 0  }
   0x4   :  { %s761_s17 = smov 0   ;;  %s763_s18 = smov 0  }
   0x5   :  { %s765_s19 = smov 0   ;;  %s767_s20 = smov 0  }
   0x6   :  { %s769_s21 = smov 0   ;;  %s771_s22 = smov 0  }
   0x7 LB: > { %926 = sst [smem:[#allocation8_spill]] %s718_s20  ;;  %s465_s23 = sadd.s32 4294967295, %s726_s22   ;;  %s726_s22 = sphi %s771_s22, %s20_s22   ;;  %s722_s21 = sphi %s769_s21, %s940_s21   ;;  %s718_s20 = sphi %s767_s20, %s939_s20   ;;  %s714_s19 = sphi %s765_s19, %s938_s19   ;;  %s710_s18 = sphi %s763_s18, %s937_s18   ;;  %s706_s17 = sphi %s761_s17, %s943_s17   ;;  %s702_s16 = sphi %s759_s16, %s942_s16   ;;  %s698_s15 = sphi %s757_s15, %s941_s15  }
   0x8   : > { %927 = sst [smem:[#allocation9_spill]] %s722_s21  ;;  %s466_s24 = sadd.s32 4294967294, %s726_s22  }
   0x9   : > { %s29_s25 = sadd.s32 1, %s718_s20  ;;  %s32_s26 = sadd.s32 1, %s722_s21 }
   0xa   : > { %p30_p0 = scmp.ge.s32.totalorder %s29_s25, 2  ;;  %s67_s27 = sadd.s32 1, %s706_s17 }
   0xb   : > { %p74_p1 = scmp.ne.s32.totalorder %s706_s17, %s702_s16  ;;  %p75_p2 = scmp.eq.s32.totalorder %s726_s22, 0 }
   0xc   : > { %s945_s25 = smov (%p30_p0, %s29_s25), 0  ;;  %s947_s26 = smov (!%p30_p0, %s32_s26), %s722_s21 }
   0xd   : > { %928 = sst [smem:[#allocation10_spill]] %s945_s25  ;;  %s63_s28 = ssub.s32 %s718_s20, %s945_s25 }
   0xe   : > { %p810_p3 = por %p75_p2, %p74_p1  ;;  %p34_p4 = scmp.ge.s32.totalorder %s947_s26, 2 }
   0xf   : > { %p80_p5 = scmp.ne.s32.totalorder %s702_s16, %s698_s15  ;;  %p81_p6 = scmp.eq.s32.totalorder %s465_s23, 0 }
  0x10   : > { %p148_p7 = scmp.eq.s32.totalorder %s465_s23, 3  ;;  %s949_s26 = smov (%p34_p4, %s947_s26), 0 }
  0x11   : > { %930 = sst [smem:[#allocation11_spill]] %s949_s26  ;;  %p818_p8 = por %p81_p6, %p80_p5 }
  0x12   : > { %p822_p9 = por %p148_p7, %p74_p1  ;;  %s62_s6 = ssub.s32 %s722_s21, %s949_s26 }
  0x13   : > { %p154_p10 = scmp.eq.s32.totalorder %s466_s24, 3  ;;  %s64_s7 = sor.u32 %s63_s28, %s62_s6 }
  0x14   : > { %p65_p11 = scmp.eq.s32.totalorder %s64_s7, 0  ;;  %p527_p13 = scmp.lt.s32.totalorder %s726_s22, 4 }
  0x15   : > { %p828_p12 = por %p154_p10, %p80_p5  ;;  %s187_s9 = sand.u32 1, %s706_s17  }
  0x16   : > { %s835_s10 = scalar_select %p65_p11, %s706_s17, %s67_s27  }
  0x17   : > { %s512_s11 = smul.u32 48, %s187_s9  ;;  %s469_s12 = sshll.u32 %s718_s20, 1 }
  0x18   : > { %934 = sst [smem:[#allocation12_spill]] %s835_s10  ;;  %s513_s13 = smul.u32 24, %s722_s21 }
  0x19   : > { %p841_p0 = pnand %p527_p13, %p810_p3  ;;  %s191_s24 = scalar_lea.vmem [#allocation2], %s512_s11 }
  0x1a   : > { %s196_s23 = sadd.s32 %s513_s13, %s469_s12  ;;  %s201_s28 = sshll.u32 %s191_s24, 4  ;;  %s202_s28 = int_to_ptr.vmem [resolvable:$true] %s201_s28 }
  0x1b   : > { %s470_s6 = sshll.u32 %s196_s23, 2  ;;  %p471_p1 = scmp.ge.s32.totalorder %s726_s22, 1 }
  0x1c   : > { %s198_s27 = scalar_lea.hbm %s918_s1, %s470_s6  ;;  %s188_s21 = scalar_lea.sflag [#allocation3], %s187_s9 }
  0x1d   : > { %s199_s25 = sshll.u32 %s198_s27, 4  ;;  %s728_s29 = smov 256   ;;  %s200_s25 = int_to_ptr.hbm [resolvable:$true] %s199_s25 }
  0x1e   : > { %s729_s20 = smov 128   ;;  %s730_s10 = smov 8  }
  0x1f   : > { %522 = dma.hbm_to_vmem [thread:$0]  (!%p841_p0), %s200_s25, 768, %s202_s28, %s188_s21, %s728_s29, %s729_s20, %s730_s10  }
  0x20   : > { %p209_p2 = scmp.lt.s32.totalorder %s726_s22, 5 }
  0x22   : > { %p210_p3 = pnand %p471_p1, %p209_p2 }
  0x23   : > { %s853_s11 = sand.u32 (!%p210_p3), 1, %s702_s16  }
  0x24   : > { %213 = sbr.rel (%p210_p3) target bundleno = 194 (0xc2), region = 36  ;;  %s216_s12 = scalar_lea.sflag (!%p210_p3), [#allocation3], %s853_s11 }
  0x25   : > { %s514_s26 = smul.u32 (!%p210_p3), 48, %s853_s11 }
  0x27   : > { %s219_s13 = scalar_lea.vmem (!%p210_p3), [#allocation2], %s514_s26 }
  0x29   : > { %689 = dma.done.wait (%p818_p8), %s216_s12, 768  }
  0x2a   : > { %691 = vsyncadd (%p818_p8), %s216_s12, 4294966528  ;;  %v731_v0 = vmov 0   ;;  %p249_p4 = scmp.lt.s32.totalorder %s714_s19, 1  ;;  %v492_v1 = vld [vmem:[%s219_s13 + $0x20] sm:$0xf]  ;;  %vm293_vm0 = vcmask 392192  }
  0x2b   : > { %597 = vset.pattern.permute.xlu0 %v731_v0  ;;  %v511_v2 = vld [vmem:[%s219_s13 + $0x24] sm:$0xf0]  ;;  %v510_v3 = vld [vmem:[%s219_s13 + $0x24] sm:$0xf]  ;;  %v494_v5 = vld [vmem:[%s219_s13 + $0x28] sm:$0xf0] }
  0x2c   : > { %s250_s20 = scalar_select %p249_p4, %s714_s19, 1  ;;  %v493_v4 = vor.u32 %v511_v2, %v492_v1  ;;  %v484_v6 = vld [vmem:[%s219_s13 + $0x10] sm:$0xf]  ;;  %v509_v7 = vld [vmem:[%s219_s13 + $0x14] sm:$0xf0]  ;;  %v497_v8 = vor.u32 %v510_v3, %v494_v5 }
  0x2d   : > { %v508_v9 = vld [vmem:[%s219_s13 + $0x14] sm:$0xf]  ;;  %v486_v10 = vld [vmem:[%s219_s13 + $0x18] sm:$0xf0]  ;;  %v485_v12 = vor.u32 %v509_v7, %v484_v6  ;;  %v476_v14 = vld [vmem:[%s219_s13] sm:$0xf] }
  0x2e   : > { %v323_v11 = vld [vmem:[%s919_s2] sm:$0xff]  ;;  %302 = vmatpush.bf16.msra.mxu0 %v493_v4  ;;  %315 = vmatpush.bf16.msra.mxu1 %v497_v8  ;;  %v489_v13 = vor.u32 %v508_v9, %v486_v10  ;;  %v507_v15 = vld [vmem:[%s219_s13 + $0x4] sm:$0xf0]  ;;  %v478_v17 = vld [vmem:[%s219_s13 + $0x8] sm:$0xf0]  ;;  %s473_s30 = sshll.u32 %s250_s20, 2 }
  0x2f   : > { %326 = vperm.xlu0 %597, %v323_v11   ;;  %v506_v16 = vld [vmem:[%s219_s13 + $0x4] sm:$0xf]  ;;  %v477_v18 = vor.u32 %v507_v15, %v476_v14  ;;  %s252_s14 = scalar_lea.vmem %s917_s0, %s473_s30  ;;  %s501_s28 = sshll.u32 %s710_s18, 1 }
  0x30   : > { %v481_v19 = vor.u32 %v506_v16, %v478_v17  ;;  %v331_v20 = vld [vmem:[%s920_s3] sm:$0xff]  ;;  %s502_s6 = sshll.u32 %s714_s19, 2  ;;  %s472_s27 = sshll.u32 %s853_s11, 4 }
  0x31   : > { %v256_v21 = vld [vmem:[%s252_s14] sm:$0xf]  ;;  %s359_s7 = sadd.s32 %s502_s6, %s501_s28  ;;  %s248_s20 = scalar_lea.vmem [#allocation5], %s472_s27 }
  0x32   : > { %303 = vmatpush.bf16.msra.mxu0 %v485_v12  ;;  %316 = vmatpush.bf16.msra.mxu1 %v489_v13  ;;  %s503_s29 = sshll.u32 %s359_s7, 3  ;;  %s363_s21 = sshll.u32 %s248_s20, 4  ;;  %s364_s21 = int_to_ptr.vmem [resolvable:$true] %s363_s21 }
  0x33   : > { %s361_s13 = scalar_lea.hbm %s921_s4, %s503_s29  ;;  %s348_s18 = scalar_lea.sflag [#allocation4], %s853_s11 }
  0x34   : > { %s365_s25 = sshll.u32 %s361_s13, 4  ;;  %s648_s14 = scalar_lea.hbm %s921_s4, 64  ;;  %s366_s25 = int_to_ptr.hbm [resolvable:$true] %s365_s25 }
  0x35   : > { %s642_s19 = sshra.s32 %s366_s25, 4  ;;  %s643_s19 = int_to_ptr.hbm [resolvable:$true] %s642_s19 }
  0x36   : > { %304 = vmatpush.bf16.msra.mxu0 %v477_v18  ;;  %317 = vmatpush.bf16.msra.mxu1 %v481_v19  ;;  %s644_s30 = scalar_lea.hbm %s643_s19, 16  ;;  %p649_p8 = scmp.lt.s32.totalorder %s643_s19, %s921_s4 }
  0x37   : > { %334 = vperm.xlu0 %597, %v331_v20   ;;  %p645_p5 = scmp.ne.s32.totalorder %s643_s19, %s644_s30  ;;  %p650_p10 = scmp.lt.s32.totalorder %s648_s14, %s644_s30 }
  0x39   : > { %498 = vmatmul.msk.bf16.vlgmr.msra.gmra.mxu0 %vm293_vm0, %v256_v21  ;;  %499 = vmatmul.msk.bf16.vlgmr.msra.gmra.mxu1 %vm293_vm0, %v256_v21  ;;  %p646_p6 = pnand %p645_p5, %p822_p9  ;;  %p651_p11 = por %p650_p10, %p649_p8 }
  0x3b   : > { %p647_p7 = pneg %p646_p6 }
  0x3d   : > { %p652_p13 = pnand %p651_p11, %p647_p7 }
  0xa1   : > { %v327_v22 = vpop.permute.xlu0 %326 }
  0xa9   : > { %v335_v26 = vpop.permute.xlu0 %334 }
  0xb6   : > { %v306_v23 = vpop.f32.mrf.mxu0  ;;  %v319_v25 = vpop.f32.mrf.mxu1 }
  0xb7   : > { %v329_v24 = vmul.f32 %v327_v22, %v306_v23  ;;  %v330_v27 = vmul.f32 %v327_v22, %v319_v25 }
  0xb9   : > { %v337_v28 = vadd.f32 %v335_v26, %v329_v24  ;;  %v338_v29 = vadd.f32 %v335_v26, %v330_v27 }
  0xbb   : > { %vm339_vm1 = vcmp.ge.f32.partialorder %v337_v28, 0.0  ;;  %v341_v30 = vmul.f32 0.2, %v337_v28  ;;  %vm340_vm2 = vcmp.ge.f32.partialorder %v338_v29, 0.0  ;;  %v342_v31 = vmul.f32 0.2, %v338_v29 }
  0xbd   : > { %v343_v32 = vsel %vm339_vm1, %v337_v28, %v341_v30  ;;  %v344_v33 = vsel %vm340_vm2, %v338_v29, %v342_v31 }
  0xbe   : > { %v308_v34 = vpop.f32.mrf.mxu0  ;;  %345 = vst [vmem:[%s248_s20] sm:$0xff] %v343_v32  ;;  %v321_v35 = vpop.f32.mrf.mxu1 }
  0xbf   : > { %346 = vst [vmem:[%s248_s20 + $0x8] sm:$0xff] %v344_v33 }
  0xc0   : > { %655 = shalt.err (!%p652_p13)
}
  0xc1   : > { %517 = dma.vmem_to_hbm [thread:$0]  (%p822_p9), %s364_s21, 256, %s366_s25, %s348_s18  }
  0xc2 PF: > { %p528_p0 = scmp.ge.s32.totalorder %s726_s22, 2  ;;  %s377_s11 = sand.u32 1, %s698_s15  }
  0xc3   : > { %s378_s28 = scalar_lea.sflag [#allocation4], %s377_s11 }
  0xc4   : > { %p524_p1 = pnand %p528_p0, %p828_p12 }
  0xc6   : > { %p525_p2 = pneg %p524_p1 }
  0xc8   : > { %693 = dma.done.wait (%p525_p2), %s378_s28, 256  }
  0xc9   : > { %695 = vsyncadd (%p525_p2), %s378_s28, 4294967040  ;;  %s20_s22 = sadd.s32 1, %s726_s22   ;;  %s936_s6 = sld [smem:[#allocation12_spill]] }
  0xca   : > { %p17_p3 = scmp.ge.s32.totalorder %s20_s22, 6   ;;  %s937_s18 = sld [smem:[#allocation8_spill]] }
  0xcb   : > { %s938_s19 = sld [smem:[#allocation9_spill]]  ;;  %s941_s15 = smov %s702_s16 }
  0xcc   : > { %s939_s20 = sld [smem:[#allocation10_spill]]  ;;  %s942_s16 = smov %s706_s17 }
  0xcd   : > { %s940_s21 = sld [smem:[#allocation11_spill]]  ;;  %19 = sbr.rel (!%p17_p3) target bundleno = 7 (0x7), region = 84 }
  0xcf   : > { %s943_s17 = smov %s936_s6 }
  0xd2   :  { %384 = vsyncpa [#allocation3], 1 }
  0xd3   :  { %386 = vsyncpa [#allocation3 + $0x1], 1 }
  0xd4   :  { %387 = vsyncpa [#allocation4], 1 }
  0xd5   :  { %389 = vsyncpa [#allocation4 + $0x1], 1 }

</bundles_post_ra>
